<compile_context>
chip_gen: v5e
topology: v5e:2x2
jax: 0.10.0
libtpu: 0.0.40
codegen_flags: <defaults>
</compile_context>

<pallas_src>
import functools
import math

import jax
import jax.numpy as jnp
from jax import lax
from jax.experimental import pallas as pl
from jax.experimental.pallas import tpu as pltpu


# ---------------------------------------------------------------------------
# helpers
# ---------------------------------------------------------------------------
def _round_up(x, m):
    return ((x + m - 1) // m) * m


def _shrink(t, unit):
    # halve a tile size while keeping it a positive multiple of `unit`
    return max(unit, (t // 2) // unit * unit)


_VMEM_TILE_BUDGET = 8 * 1024 * 1024  # conservative: fits v5e's 16 MiB default scope


def _choose_sim_tiles(nq, nda, d):
    """Tile sizes for the (Nq, Nda) output grid.

    tm: multiple of 8 (sublane), tn: multiple of 128 (lane-dense output -> no
    masked vst.msk partial stores). Estimate assumes double-buffered DMA on
    every operand (2x inputs + 2x output tile)."""
    tm = min(_round_up(nq, 8), 256)
    tn = min(_round_up(nda, 128), 512)

    def est(tm_, tn_):
        return 4 * (2 * tm_ * d + 2 * tn_ * d + 2 * tm_ * tn_)

    while est(tm, tn) > _VMEM_TILE_BUDGET and (tn > 128 or tm > 8):
        if tn > 128:
            tn = _shrink(tn, 128)
        else:
            tm = _shrink(tm, 8)
    return tm, tn


def _choose_mm_tile(nq, d):
    """Row-tile for the hoisted h_q @ W matmul (W kept fully resident)."""
    tm = min(_round_up(nq, 8), 256)

    def est(tm_):
        return 4 * (2 * tm_ * d + d * d + 2 * tm_ * d)

    while est(tm) > _VMEM_TILE_BUDGET and tm > 8:
        tm = _shrink(tm, 8)
    # TODO(synk): for very large D (>= ~4096) add a K-reduction grid axis with a
    # VMEM f32 accumulator instead of keeping the full (D, D) W block resident.
    return tm


# ---------------------------------------------------------------------------
# Pallas kernels
# ---------------------------------------------------------------------------
def _row_matmul_kernel(x_ref, w_ref, o_ref):
    # (tm, D) @ (D, D) -> (tm, D).  W's BlockSpec index_map is constant (0, 0),
    # so the weight tile is DMA'd once and stays resident across the row grid.
    o_ref[...] = jnp.dot(x_ref[...], w_ref[...],
                         preferred_element_type=jnp.float32)


def _sim_tile_kernel(a_ref, b_ref, o_ref, *, scale, negative_slope,
                     use_leaky, use_exp):
    # out tile = epilogue( (a @ b^T) * scale ), but without an in-kernel
    # transpose: contract the last (feature) axis of BOTH operands directly on
    # the MXU via dot_general, avoiding an XLU vxpose pass per tile.
    s = lax.dot_general(a_ref[...], b_ref[...],
                        dimension_numbers=(((1,), (1,)), ((), ())),
                        preferred_element_type=jnp.float32)
    s = s * scale                      # compile-time constant multiply (no div)
    if use_leaky:
        s = jnp.where(s >= 0, s, negative_slope * s)
    if use_exp:
        s = jnp.exp(s)                 # EUP slot, hidden behind the MXU work
    o_ref[...] = s


# ---------------------------------------------------------------------------
# Wrapper module
# ---------------------------------------------------------------------------
class SimilarityPallas:
    """Pallas port of the PyTorch `simlarity` module.

    mode 0: exp((h_q @ W @ h_da^T) / tau)
    mode 1: (h_q @ h_da^T) / sqrt(D)
    mode 2: leaky_relu((h_q @ h_da^T) / sqrt(D))
    """

    def __init__(self, modeforsim_0forE_1forDot_2forleakyrelu, h_dimension,
                 negative_slope=0.2, tauForE=1.0, key=None,
                 force_pallas=False, small_problem_threshold=1 << 18):
        self.mode = modeforsim_0forE_1forDot_2forleakyrelu
        self.h_dimension = h_dimension
        self.h_dimension_sqrt = h_dimension ** 0.5
        self.negative_slope = float(negative_slope)
        self.tauForE = float(tauForE)
        self.force_pallas = force_pallas
        self.small_problem_threshold = small_problem_threshold
        self.w = None
        if self.mode == 0:
            if key is None:
                key = jax.random.PRNGKey(0)
            # xavier_uniform_: U(-a, a) with a = sqrt(6 / (fan_in + fan_out))
            bound = math.sqrt(6.0 / (h_dimension + h_dimension))
            self.w = jax.random.uniform(
                key, (h_dimension, h_dimension), dtype=jnp.float32,
                minval=-bound, maxval=bound)

    # -- plain-JAX path for tiny problems (launch overhead dominates) --------
    def _jnp_fallback(self, h_da, h_q):
        if self.mode == 0:
            s = (h_q @ self.w) @ h_da.T
            return jnp.exp(s * (1.0 / self.tauForE))
        s = (h_q @ h_da.T) * (1.0 / self.h_dimension_sqrt)
        if self.mode == 2:
            s = jnp.where(s >= 0, s, self.negative_slope * s)
        return s

    # -- hoisted h_q @ W (computed ONCE, not per output tile) ----------------
    def _pallas_hq_w(self, h_q):
        nq, d = h_q.shape
        tm = _choose_mm_tile(nq, d)
        nq_p = _round_up(nq, tm)
        x_p = h_q if nq_p == nq else jnp.pad(h_q, ((0, nq_p - nq), (0, 0)))
        out = pl.pallas_call(
            _row_matmul_kernel,
            out_shape=jax.ShapeDtypeStruct((nq_p, d), jnp.float32),
            grid=(nq_p // tm,),
            in_specs=[pl.BlockSpec((tm, d), lambda i: (i, 0)),
                      pl.BlockSpec((d, d), lambda i: (0, 0))],   # W resident
            out_specs=pl.BlockSpec((tm, d), lambda i: (i, 0)),
            compiler_params=pltpu.CompilerParams(
                dimension_semantics=("parallel",)),
        )(x_p, self.w)
        return out[:nq] if nq_p != nq else out

    # -- tiled (Nq, Nda) similarity grid --------------------------------------
    def _pallas_similarity(self, a, h_da, *, scale, use_leaky, use_exp):
        nq, d = a.shape
        nda, _ = h_da.shape
        tm, tn = _choose_sim_tiles(nq, nda, d)
        nq_p = _round_up(nq, tm)
        nda_p = _round_up(nda, tn)
        a_p = a if nq_p == nq else jnp.pad(a, ((0, nq_p - nq), (0, 0)))
        b_p = h_da if nda_p == nda else jnp.pad(h_da, ((0, nda_p - nda), (0, 0)))

        kernel = functools.partial(
            _sim_tile_kernel, scale=scale,
            negative_slope=self.negative_slope,
            use_leaky=use_leaky, use_exp=use_exp)

        out = pl.pallas_call(
            kernel,
            out_shape=jax.ShapeDtypeStruct((nq_p, nda_p), jnp.float32),
            grid=(nq_p // tm, nda_p // tn),
            in_specs=[pl.BlockSpec((tm, d), lambda i, j: (i, 0)),
                      pl.BlockSpec((tn, d), lambda i, j: (j, 0))],
            out_specs=pl.BlockSpec((tm, tn), lambda i, j: (i, j)),
            compiler_params=pltpu.CompilerParams(
                dimension_semantics=("parallel", "parallel")),
        )(a_p, b_p)
        if nq_p != nq or nda_p != nda:
            out = out[:nq, :nda]
        return out

    def __call__(self, h_da, h_q):
        h_da = jnp.asarray(h_da, jnp.float32)
        h_q = jnp.asarray(h_q, jnp.float32)
        nq, d = h_q.shape
        nda, _ = h_da.shape

        # Tiny problems: pure launch overhead on the MXU -> plain XLA.
        if (not self.force_pallas
                and nq * nda * d < self.small_problem_threshold):
            return self._jnp_fallback(h_da, h_q)

        if self.mode == 0:
            mm = self._pallas_hq_w(h_q)          # hoisted out of the (i, j) grid
            return self._pallas_similarity(
                mm, h_da, scale=1.0 / self.tauForE,
                use_leaky=False, use_exp=True)
        return self._pallas_similarity(
            h_q, h_da, scale=1.0 / self.h_dimension_sqrt,
            use_leaky=(self.mode == 2), use_exp=False)

    # TODO(synk): optional bf16 operand cast (f32 accumulation) for v6e/v7x MXU
    # throughput; kept f32 here to match the PyTorch reference bit-for-bit-ish.


# ---------------------------------------------------------------------------
# Pure-JAX reference (for correctness checking)
# ---------------------------------------------------------------------------
def _ref(mode, h_da, h_q, w, tau, neg_slope, d):
    if mode == 0:
        s = (h_q @ w) @ h_da.T
        return jnp.exp(s / tau)
    s = (h_q @ h_da.T) / (d ** 0.5)
    if mode == 2:
        s = jnp.where(s >= 0, s, neg_slope * s)
    return s


if __name__ == "__main__":
    key = jax.random.PRNGKey(0)
    k_w, k_q, k_da = jax.random.split(key, 3)

    D = 32       # h_dimension
    NQ = 8       # number of query rows
    NDA = 8      # number of "da" rows

    h_q = jax.random.normal(k_q, (NQ, D), dtype=jnp.float32)
    h_da = jax.random.normal(k_da, (NDA, D), dtype=jnp.float32)

    ok = True
    for mode in (0, 1, 2):
        sim = SimilarityPallas(mode, D, negative_slope=0.2, tauForE=1.0,
                               key=k_w, force_pallas=True)
        out = sim(h_da, h_q)
        out = jax.block_until_ready(out)
        ref = _ref(mode, h_da, h_q, sim.w, 1.0, 0.2, D)
        if not jnp.allclose(out, ref, rtol=1e-5, atol=1e-5):
            ok = False

    if ok:
        print("KERNEL_OK")
</pallas_src>

<mosaic_0001>
module attributes {stable_mosaic.version = 11 : i64} {
  func.func @_row_matmul_kernel(%arg0: i32, %arg1: memref<8x32xf32, #tpu.memory_space<vmem>>, %arg2: memref<32x32xf32, #tpu.memory_space<vmem>>, %arg3: memref<8x32xf32, #tpu.memory_space<vmem>>) attributes {dimension_semantics = [#tpu.dimension_semantics<parallel>], iteration_bounds = array<i64: 1>, scalar_prefetch = 0 : i64, scratch_operands = 0 : i64, tpu.core_type = #tpu.core_type<tc>, window_params = [{transform_indices = @transform_0, window_bounds = array<i64: 8, 32>}, {pipeline_mode = #tpu.pipeline_mode<synchronous>, transform_indices = @transform_1, window_bounds = array<i64: 32, 32>}, {transform_indices = @transform_2, window_bounds = array<i64: 8, 32>}]} {
    %c0 = arith.constant 0 : index
    %c0_0 = arith.constant 0 : index
    %0 = vector.load %arg1[%c0, %c0_0] : memref<8x32xf32, #tpu.memory_space<vmem>>, vector<8x32xf32>
    %c0_1 = arith.constant 0 : index
    %c0_2 = arith.constant 0 : index
    %1 = vector.load %arg2[%c0_1, %c0_2] : memref<32x32xf32, #tpu.memory_space<vmem>>, vector<32x32xf32>
    %cst = arith.constant dense<0.000000e+00> : vector<8x32xf32>
    %2 = tpu.matmul %0, %1, %cst {dimension_numbers = #tpu.dot_dimension_numbers<[1], [0], [0], [1], [0, 0, 1, 1], [], []>} : vector<8x32xf32>, vector<32x32xf32>, vector<8x32xf32> -> vector<8x32xf32>
    %c0_3 = arith.constant 0 : index
    %c0_4 = arith.constant 0 : index
    %3 = vector.load %arg3[%c0_3, %c0_4] : memref<8x32xf32, #tpu.memory_space<vmem>>, vector<8x32xf32>
    tpu.vector_store %arg3[%c0_3, %c0_4], %2 {strides = array<i32>} : memref<8x32xf32, #tpu.memory_space<vmem>>, vector<8x32xf32>,
    return
  }
  func.func @transform_0(%arg0: i32) -> (i32, i32) {
    %c0_i32 = arith.constant 0 : i32
    %c0_i32_0 = arith.constant 0 : i32
    return %arg0, %c0_i32 : i32, i32
  }
  func.func @transform_1(%arg0: i32) -> (i32, i32) {
    %c0_i32 = arith.constant 0 : i32
    %c0_i32_0 = arith.constant 0 : i32
    %c0_i32_1 = arith.constant 0 : i32
    return %c0_i32, %c0_i32_0 : i32, i32
  }
  func.func @transform_2(%arg0: i32) -> (i32, i32) {
    %c0_i32 = arith.constant 0 : i32
    %c0_i32_0 = arith.constant 0 : i32
    return %arg0, %c0_i32 : i32, i32
  }
}

</mosaic_0001>

<bundles_post_ra>
// kernel: tpu_custom_call.1
= control target key start
LH: loop header
LB: loop body
LE: loop exit
PB: predicated region body
PF: predicated region fallthrough
CT: control target
= control target key end

     0   :  { %7 = vsyncpa [#allocation3], 0  ;;  %s203_s0 = inlined_call_operand.hbm [shape: f32[8,32], index: 0, kind: input, shape index: {}]   ;;  %s204_s1 = inlined_call_operand.hbm [shape: f32[32,32], index: 1, kind: input, shape index: {}]   ;;  %s205_s2 = inlined_call_operand.hbm [shape: f32[8,32], index: 2, kind: output, shape index: {}]  }
   0x1   :  { %8 = vsyncpa [#allocation6], 0 }
   0x2   :  { %9 = vsyncpa [#allocation4], 0  ;;  %s15_s11 = sshll.u32 %s203_s0, 4  ;;  %s174_s12 = smov [#allocation2]   ;;  %s16_s11 = int_to_ptr.hbm [resolvable:$true] %s15_s11 }
   0x3   :  { %s17_s13 = sshll.u32 %s174_s12, 4  ;;  %s25_s16 = sshll.u32 %s204_s1, 4  ;;  %s18_s13 = int_to_ptr.vmem [resolvable:$true] %s17_s13  ;;  %s26_s16 = int_to_ptr.hbm [resolvable:$true] %s25_s16 }
   0x4   :  { %20 = dma.hbm_to_vmem [thread:$0]  %s16_s11, 128, %s18_s13, [#allocation3]  }
   0x5   :  { %s175_s17 = smov [#allocation5]   ;;  %s176_s19 = smov 128  }
   0x6   :  { %s27_s18 = sshll.u32 %s175_s17, 4  ;;  %s177_s20 = smov 8   ;;  %s28_s18 = int_to_ptr.vmem [resolvable:$true] %s27_s18 }
   0x7   :  { %33 = dma.hbm_to_vmem [thread:$0]  %s26_s16, 512, %s28_s18, [#allocation6], %s176_s19, %s176_s19, %s177_s20  }
   0x8   :  { %168 = dma.done.wait [#allocation3], 128  }
   0x9   :  { %169 = vsyncadd [#allocation3], 4294967168 }
   0xa   :  { %170 = dma.done.wait [#allocation6], 512  }
   0xb   :  { %171 = vsyncadd [#allocation6], 4294966784  ;;  %v46_v0 = vld [vmem:[#allocation5 + $0x18] sm:$0xff]  ;;  %v45_v1 = vld [vmem:[#allocation5 + $0x10] sm:$0xff]  ;;  %vm47_vm0 = vcmask 261120   ;;  %s178_s0 = smov [#allocation7]  }
   0xc   :  { %63 = vmatpush.msra.mxu0 %v46_v0  ;;  %v44_v2 = vld [vmem:[#allocation5 + $0x8] sm:$0xff]  ;;  %v43_v3 = vld [vmem:[#allocation5] sm:$0xff]  ;;  %v42_v4 = vld [vmem:[#allocation2] sm:$0xff]  ;;  %s77_s1 = sshll.u32 %s178_s0, 4  ;;  %s79_s23 = sshll.u32 %s205_s2, 4  ;;  %s78_s1 = int_to_ptr.vmem [resolvable:$true] %s77_s1  ;;  %s80_s23 = int_to_ptr.hbm [resolvable:$true] %s79_s23 }
   0xe   :  { %64 = vmatpush.msra.mxu0 %v45_v1 }
  0x10   :  { %65 = vmatpush.msra.mxu0 %v44_v2 }
  0x12   :  { %66 = vmatpush.msra.mxu0 %v43_v3 }
  0x13   :  { %90 = vmatmul.msk.f32.vlgmr.msra.gmra.mxu0 %vm47_vm0, %v42_v4 }
  0x90   :  { %v68_v5 = vpop.f32.mrf.mxu0 }
  0x91   :  { %71 = vst.msk [vmem:[#allocation7] sm:$0xff] %vm47_vm0, %v68_v5 }
  0x92   :  { %82 = dma.vmem_to_hbm [thread:$0]  %s78_s1, 128, %s80_s23, [#allocation4]  }
  0x93   :  { %172 = dma.done.wait [#allocation4], 128  }
  0x94   :  { %173 = vsyncadd [#allocation4], 4294967168 }
  0x95   :  { %87 = vsyncpa [#allocation3], 1 }
  0x96   :  { %88 = vsyncpa [#allocation6], 1 }
  0x97   :  { %89 = vsyncpa [#allocation4], 1 }

</bundles_post_ra>
